<compile_context>
chip_gen: v7x
topology: tpu7x:2x2x1
jax: 0.10.0
libtpu: 0.0.40
codegen_flags: <defaults>
</compile_context>

<pallas_src>
import dataclasses
import functools
import math

import jax
import jax.numpy as jnp
from jax import lax
from jax.experimental import pallas as pl
from jax.experimental.pallas import tpu as pltpu


# ----------------------------------------------------------------------------
# Per-generation configuration
# ----------------------------------------------------------------------------

@dataclasses.dataclass(frozen=True)
class _TpuConfig:
    phys_vmem: int          # physical VMEM per TensorCore (bytes)
    num_cores: int          # TensorCores per chip
    workset_bytes: int      # per-grid-step working-set target (in+out+f32 temps)
    min_tiles: int          # force >= this many grid steps (for CORE_PARALLEL)
    mxu_precision: lax.Precision


@functools.lru_cache(maxsize=1)
def _tpu_config():
    phys_vmem = 128 * 1024 * 1024
    kind = ""
    try:
        kind = jax.devices()[0].device_kind.lower()
    except Exception:
        pass
    try:
        info = pltpu.get_tpu_info()
        v = getattr(info, "vmem_capacity_bytes", None)
        if v:
            phys_vmem = int(v)
    except Exception:
        pass

    num_cores = 2 if "v7" in kind else 1
    if "v7" in kind:
        phys_vmem = min(phys_vmem, 64 * 1024 * 1024)

    # Double-buffered in+out blocks plus in-kernel f32 temporaries per step:
    # 24 MiB on 128-MiB-VMEM parts (v5e/v6e), 12 MiB on 64-MiB parts (v7x).
    workset = 24 * 1024 * 1024 if phys_vmem >= (96 << 20) else 12 * 1024 * 1024

    # HIGHEST (6-pass) f32 matmul is MXU-bound on v5e's 197 TF/s MXU for the
    # small-C segmented-sum; HIGH (3-pass) keeps the group sums ~f32-accurate
    # and puts the kernel back on the HBM roofline. v6e/v7x hide HIGHEST.
    mxu_precision = lax.Precision.HIGH if "v5" in kind else lax.Precision.HIGHEST

    min_tiles = num_cores  # only force >=2 grid steps when 2 TCs can share them
    return _TpuConfig(phys_vmem, num_cores, workset, min_tiles, mxu_precision)


def _sublane_unit(dtype):
    # 8 for f32, 16 for bf16, 32 for int8/fp8: keep row tiles native-packed.
    return max(8, 32 // max(1, jnp.dtype(dtype).itemsize))


def _per_unit_bytes(other_elems, dtype_bytes, f32_temps=3):
    # 2 pipeline buffers x (in + out) in native dtype, plus the f32 working
    # copies (x.astype(f32), d, y) that the kernel body materializes per tile.
    return other_elems * (4 * dtype_bytes + f32_temps * 4)


def _pick_tile(total, per_unit_bytes, *, unit, cap, workset, min_tiles=1):
    """Largest tile (multiple of `unit`, <= cap) whose full per-step footprint
    (double-buffered in+out plus f32 temporaries) fits `workset`; optionally
    keeps >= min_tiles grid steps so CORE_PARALLEL has work for every TC."""
    tile = max(unit, workset // max(per_unit_bytes, 1))
    tile = min(tile, cap, total)
    if min_tiles > 1 and total >= min_tiles * unit:
        tile = min(tile, -(-total // min_tiles))   # ceil(total / min_tiles)
    if tile >= total:
        return total                               # full extent is always legal
    return max(unit, (tile // unit) * unit)


def _vmem_limit(block_bytes, cfg):
    # Derived from the actually-chosen blocks, with 2x headroom for compiler
    # scratch, and kept well under physical VMEM (matters on 64-MiB v7x).
    cap = max(32 * 1024 * 1024, cfg.phys_vmem - 16 * 1024 * 1024)
    return int(min(cap, max(32 * 1024 * 1024, 2 * block_bytes)))


def _dim_semantics(grid, cfg, core_axis=None):
    """Single-TC chips: plain 'parallel'. Multi-TC chips: mark the big axis
    CORE_PARALLEL (the only semantics that changes codegen / shards work)."""
    if cfg.num_cores >= 2:
        axis = core_axis
        if axis is None:
            axis = max(range(len(grid)), key=lambda a: grid[a])
        if grid[axis] >= cfg.num_cores:
            sems = [pltpu.PARALLEL] * len(grid)
            sems[axis] = pltpu.CORE_PARALLEL
            return tuple(sems)
    return tuple("parallel" for _ in grid)


# ----------------------------------------------------------------------------
# Kernel bodies
# ----------------------------------------------------------------------------

def _ln_rows_kernel(x_ref, w_ref, b_ref, o_ref, *, eps):
    """channels_last, generic C: block (tile_rows, C); normalize over lanes.
    Minimal VALU path: sub, mul, mul, mul, add per element; rsqrt on EUP."""
    x = x_ref[...].astype(jnp.float32)
    u = jnp.mean(x, axis=-1, keepdims=True)
    d = x - u
    v = jnp.mean(d * d, axis=-1, keepdims=True)
    r = lax.rsqrt(v + eps)                                   # EUP slot
    o_ref[...] = ((d * r) * w_ref[...] + b_ref[...]).astype(o_ref.dtype)


def _ln_small_c_kernel(x_ref, w_ref, b_ref, seg_ref, o_ref, *, c, eps, precision):
    """channels_last, small C packed lane-dense.

    x block is (tile_sub, 128); each group of `c` adjacent lanes is one
    normalization row. seg is a (128,128) block-diagonal 0/1 matrix so
    `x @ seg` broadcasts every group-sum to all lanes of its group (MXU)."""
    x = x_ref[...].astype(jnp.float32)
    seg = seg_ref[...]
    inv_c = jnp.float32(1.0 / c)
    u = jnp.dot(x, seg, preferred_element_type=jnp.float32,
                precision=precision) * inv_c
    d = x - u
    v = jnp.dot(d * d, seg, preferred_element_type=jnp.float32,
                precision=precision) * inv_c
    o_ref[...] = ((d * lax.rsqrt(v + eps)) * w_ref[...] + b_ref[...]).astype(o_ref.dtype)


def _ln_cfirst_kernel(x_ref, w_ref, b_ref, o_ref, *, eps):
    """channels_first: block (bpack, C, tile_hw); normalize over C (axis=1).
    bpack > 1 only when C < 8, to fill the sublane axis of each block."""
    x = x_ref[...].astype(jnp.float32)               # (bpack, C, tile_hw)
    u = jnp.mean(x, axis=1, keepdims=True)           # (bpack, 1, tile_hw)
    d = x - u
    v = jnp.mean(d * d, axis=1, keepdims=True)
    r = lax.rsqrt(v + eps)
    # w_ref/b_ref are (C, 1): broadcast over batch (leading) and lanes (last).
    o_ref[...] = ((d * r) * w_ref[...] + b_ref[...]).astype(o_ref.dtype)


# ----------------------------------------------------------------------------
# pallas_call wrappers
# ----------------------------------------------------------------------------

def _ln_channels_last_generic(x2, weight, bias, eps, cfg):
    rows, c = x2.shape
    dtype_bytes = jnp.dtype(x2.dtype).itemsize
    per = _per_unit_bytes(c, dtype_bytes)
    tile_rows = _pick_tile(rows, per, unit=_sublane_unit(x2.dtype), cap=4096,
                           workset=cfg.workset_bytes, min_tiles=cfg.min_tiles)
    n = pl.cdiv(rows, tile_rows)
    w2 = weight.astype(jnp.float32).reshape(1, c)
    b2 = bias.astype(jnp.float32).reshape(1, c)
    kernel = functools.partial(_ln_rows_kernel, eps=float(eps))
    return pl.pallas_call(
        kernel,
        out_shape=jax.ShapeDtypeStruct((rows, c), x2.dtype),
        grid_spec=pltpu.PrefetchScalarGridSpec(
            num_scalar_prefetch=0,
            grid=(n,),
            in_specs=[
                pl.BlockSpec((tile_rows, c), lambda i: (i, 0)),
                pl.BlockSpec((1, c), lambda i: (0, 0)),
                pl.BlockSpec((1, c), lambda i: (0, 0)),
            ],
            out_specs=pl.BlockSpec((tile_rows, c), lambda i: (i, 0)),
        ),
        compiler_params=pltpu.CompilerParams(
            dimension_semantics=_dim_semantics((n,), cfg),
            vmem_limit_bytes=_vmem_limit(tile_rows * per, cfg),
        ),
        cost_estimate=pl.CostEstimate(
            flops=8 * rows * c,
            transcendentals=rows,
            bytes_accessed=2 * rows * c * dtype_bytes,
        ),
    )(x2, w2, b2)


def _ln_channels_last_small_c(x2, weight, bias, eps, cfg):
    rows, c = x2.shape
    g = 128 // c                                   # groups per 128-lane row
    sub = (rows * c) // 128                        # = rows // g
    dtype_bytes = jnp.dtype(x2.dtype).itemsize
    xp = x2.reshape(sub, 128)                      # free reshape (contiguous)
    per = _per_unit_bytes(128, dtype_bytes)
    tile_sub = _pick_tile(sub, per, unit=_sublane_unit(x2.dtype), cap=4096,
                          workset=cfg.workset_bytes, min_tiles=cfg.min_tiles)
    n = pl.cdiv(sub, tile_sub)
    w_t = jnp.tile(weight.astype(jnp.float32), g).reshape(1, 128)
    b_t = jnp.tile(bias.astype(jnp.float32), g).reshape(1, 128)
    lane = jnp.arange(128)
    seg = (lane[:, None] // c == lane[None, :] // c).astype(jnp.float32)
    kernel = functools.partial(_ln_small_c_kernel, c=c, eps=float(eps),
                               precision=cfg.mxu_precision)
    yp = pl.pallas_call(
        kernel,
        out_shape=jax.ShapeDtypeStruct((sub, 128), x2.dtype),
        grid_spec=pltpu.PrefetchScalarGridSpec(
            num_scalar_prefetch=0,
            grid=(n,),
            in_specs=[
                pl.BlockSpec((tile_sub, 128), lambda i: (i, 0)),
                pl.BlockSpec((1, 128), lambda i: (0, 0)),
                pl.BlockSpec((1, 128), lambda i: (0, 0)),
                pl.BlockSpec((128, 128), lambda i: (0, 0)),
            ],
            out_specs=pl.BlockSpec((tile_sub, 128), lambda i: (i, 0)),
        ),
        compiler_params=pltpu.CompilerParams(
            dimension_semantics=_dim_semantics((n,), cfg),
            vmem_limit_bytes=_vmem_limit(tile_sub * per, cfg),
        ),
        cost_estimate=pl.CostEstimate(
            flops=4 * sub * 128 * 128 + 6 * rows * c,
            transcendentals=rows,
            bytes_accessed=2 * rows * c * dtype_bytes,
        ),
    )(xp, w_t, b_t, seg)
    return yp.reshape(rows, c)


def _ln_channels_first(x3, weight, bias, eps, cfg):
    b, c, hw = x3.shape
    dtype_bytes = jnp.dtype(x3.dtype).itemsize
    # Pack several batch images per block when C < 8 so the sublane axis of
    # each (C, tile_hw) slab is not half-empty (2x VPU/VMEM efficiency at C=4).
    bpack = min(b, max(1, 8 // c)) if c < 8 else 1
    nb = pl.cdiv(b, bpack)
    per = _per_unit_bytes(bpack * c, dtype_bytes)
    # Only force extra spatial splits if the batch axis cannot feed all TCs.
    min_tiles_hw = cfg.min_tiles if nb < cfg.num_cores else 1
    tile_hw = _pick_tile(hw, per, unit=128, cap=8192,
                         workset=cfg.workset_bytes, min_tiles=min_tiles_hw)
    n_hw = pl.cdiv(hw, tile_hw)
    w2 = weight.astype(jnp.float32).reshape(c, 1)
    b2 = bias.astype(jnp.float32).reshape(c, 1)
    kernel = functools.partial(_ln_cfirst_kernel, eps=float(eps))
    grid = (nb, n_hw)
    return pl.pallas_call(
        kernel,
        out_shape=jax.ShapeDtypeStruct((b, c, hw), x3.dtype),
        grid_spec=pltpu.PrefetchScalarGridSpec(
            num_scalar_prefetch=0,
            grid=grid,
            in_specs=[
                pl.BlockSpec((bpack, c, tile_hw), lambda i, j: (i, 0, j)),
                pl.BlockSpec((c, 1), lambda i, j: (0, 0)),
                pl.BlockSpec((c, 1), lambda i, j: (0, 0)),
            ],
            out_specs=pl.BlockSpec((bpack, c, tile_hw), lambda i, j: (i, 0, j)),
        ),
        compiler_params=pltpu.CompilerParams(
            dimension_semantics=_dim_semantics(grid, cfg),
            vmem_limit_bytes=_vmem_limit(tile_hw * per, cfg),
        ),
        cost_estimate=pl.CostEstimate(
            flops=8 * b * c * hw,
            transcendentals=b * hw,
            bytes_accessed=2 * b * c * hw * dtype_bytes,
        ),
    )(x3, w2, b2)


def layer_norm(x, weight, bias, eps=1e-6, data_format="channels_last"):
    """Matches the PyTorch CellViT LayerNorm forward (biased variance)."""
    if data_format not in ("channels_last", "channels_first"):
        raise NotImplementedError
    cfg = _tpu_config()

    if data_format == "channels_last":
        c = x.shape[-1]
        lead = x.shape[:-1]
        rows = int(math.prod(lead)) if lead else 1
        x2 = x.reshape(rows, c)
        if c < 128 and 128 % c == 0 and (rows * c) % 128 == 0:
            y = _ln_channels_last_small_c(x2, weight, bias, eps, cfg)
        else:
            y = _ln_channels_last_generic(x2, weight, bias, eps, cfg)
        return y.reshape(*lead, c)
    else:
        # x: (B, C, H, W) — normalize over dim 1, no transposes (free reshape only).
        b, c, h, w = x.shape
        y = _ln_channels_first(x.reshape(b, c, h * w), weight, bias, eps, cfg)
        return y.reshape(b, c, h, w)


# ----------------------------------------------------------------------------
# Reference + self-test
# ----------------------------------------------------------------------------

def _reference(x, weight, bias, eps, data_format):
    if data_format == "channels_last":
        u = jnp.mean(x, axis=-1, keepdims=True)
        s = jnp.mean((x - u) ** 2, axis=-1, keepdims=True)
        return (x - u) / jnp.sqrt(s + eps) * weight + bias
    else:
        u = jnp.mean(x, axis=1, keepdims=True)
        s = jnp.mean((x - u) ** 2, axis=1, keepdims=True)
        xn = (x - u) / jnp.sqrt(s + eps)
        return weight[None, :, None, None] * xn + bias[None, :, None, None]


if __name__ == "__main__":
    key = jax.random.PRNGKey(0)
    k1, k2, k3 = jax.random.split(key, 3)
    eps = 1e-6

    # Deterministic, non-trivial affine params (module init is ones/zeros).
    C = 4
    weight = 1.0 + 0.1 * jnp.arange(C, dtype=jnp.float32)
    bias = 0.01 * jnp.arange(C, dtype=jnp.float32)

    # channels_first (conv-stem style): (B, C, H, W) — batch-packed sublane path.
    x_cf = jax.random.normal(k1, (2, C, 16, 16), dtype=jnp.float32)
    y_cf = jax.block_until_ready(layer_norm(x_cf, weight, bias, eps, "channels_first"))
    assert jnp.allclose(y_cf, _reference(x_cf, weight, bias, eps, "channels_first"),
                        atol=1e-5, rtol=1e-5)

    # channels_last with small C: lane-packed MXU segmented-reduce path.
    x_cl = jax.random.normal(k2, (2, 16, 16, C), dtype=jnp.float32)
    y_cl = jax.block_until_ready(layer_norm(x_cl, weight, bias, eps, "channels_last"))
    assert jnp.allclose(y_cl, _reference(x_cl, weight, bias, eps, "channels_last"),
                        atol=1e-5, rtol=1e-5)

    # channels_last generic path (C does not pack evenly into 128 lanes).
    C2 = 96
    w2 = 1.0 + 0.05 * jnp.arange(C2, dtype=jnp.float32)
    b2 = 0.02 * jnp.arange(C2, dtype=jnp.float32)
    x_t = jax.random.normal(k3, (2, 6, C2), dtype=jnp.float32)
    y_t = jax.block_until_ready(layer_norm(x_t, w2, b2, eps, "channels_last"))
    assert jnp.allclose(y_t, _reference(x_t, w2, b2, eps, "channels_last"),
                        atol=1e-5, rtol=1e-5)

    print("KERNEL_OK")
</pallas_src>

<mosaic_0001>
module attributes {stable_mosaic.version = 11 : i64} {
  func.func @_ln_cfirst_kernel(%arg0: i32, %arg1: i32, %arg2: memref<2x4x256xf32, #tpu.memory_space<vmem>>, %arg3: memref<4x1xf32, #tpu.memory_space<vmem>>, %arg4: memref<4x1xf32, #tpu.memory_space<vmem>>, %arg5: memref<2x4x256xf32, #tpu.memory_space<vmem>>) attributes {dimension_semantics = [#tpu.dimension_semantics<parallel>, #tpu.dimension_semantics<parallel>], iteration_bounds = array<i64: 1, 1>, scalar_prefetch = 0 : i64, scratch_operands = 0 : i64, tpu.core_type = #tpu.core_type<tc>, window_params = [{transform_indices = @transform_0, window_bounds = array<i64: 2, 4, 256>}, {pipeline_mode = #tpu.pipeline_mode<synchronous>, transform_indices = @transform_1, window_bounds = array<i64: 4, 1>}, {pipeline_mode = #tpu.pipeline_mode<synchronous>, transform_indices = @transform_2, window_bounds = array<i64: 4, 1>}, {transform_indices = @transform_3, window_bounds = array<i64: 2, 4, 256>}]} {
    %c0 = arith.constant 0 : index
    %c0_0 = arith.constant 0 : index
    %c0_1 = arith.constant 0 : index
    %0 = vector.load %arg2[%c0, %c0_0, %c0_1] : memref<2x4x256xf32, #tpu.memory_space<vmem>>, vector<2x4x256xf32>
    %cst = arith.constant dense<0.000000e+00> : vector<2x256xf32>
    %1 = vector.multi_reduction <add>, %0, %cst [1] : vector<2x4x256xf32> to vector<2x256xf32>
    %2 = vector.shape_cast %1 : vector<2x256xf32> to vector<2x1x256xf32>
    %cst_2 = arith.constant 4.000000e+00 : f32
    %3 = vector.broadcast %cst_2 : f32 to vector<2x1x256xf32>
    %4 = arith.divf %2, %3 : vector<2x1x256xf32>
    %5 = vector.broadcast %4 : vector<2x1x256xf32> to vector<2x4x256xf32>
    %6 = arith.subf %0, %5 : vector<2x4x256xf32>
    %7 = arith.mulf %6, %6 : vector<2x4x256xf32>
    %cst_3 = arith.constant dense<0.000000e+00> : vector<2x256xf32>
    %8 = vector.multi_reduction <add>, %7, %cst_3 [1] : vector<2x4x256xf32> to vector<2x256xf32>
    %9 = vector.shape_cast %8 : vector<2x256xf32> to vector<2x1x256xf32>
    %cst_4 = arith.constant 4.000000e+00 : f32
    %10 = vector.broadcast %cst_4 : f32 to vector<2x1x256xf32>
    %11 = arith.divf %9, %10 : vector<2x1x256xf32>
    %cst_5 = arith.constant 9.99999997E-7 : f32
    %12 = vector.broadcast %cst_5 : f32 to vector<2x1x256xf32>
    %13 = arith.addf %11, %12 : vector<2x1x256xf32>
    %14 = math.rsqrt %13 : vector<2x1x256xf32>
    %15 = vector.broadcast %14 : vector<2x1x256xf32> to vector<2x4x256xf32>
    %16 = arith.mulf %6, %15 : vector<2x4x256xf32>
    %c0_6 = arith.constant 0 : index
    %c0_7 = arith.constant 0 : index
    %17 = vector.load %arg3[%c0_6, %c0_7] : memref<4x1xf32, #tpu.memory_space<vmem>>, vector<4x1xf32>
    %18 = vector.shape_cast %17 : vector<4x1xf32> to vector<1x4x1xf32>
    %19 = vector.broadcast %18 : vector<1x4x1xf32> to vector<2x4x256xf32>
    %20 = arith.mulf %16, %19 : vector<2x4x256xf32>
    %c0_8 = arith.constant 0 : index
    %c0_9 = arith.constant 0 : index
    %21 = vector.load %arg4[%c0_8, %c0_9] : memref<4x1xf32, #tpu.memory_space<vmem>>, vector<4x1xf32>
    %22 = vector.shape_cast %21 : vector<4x1xf32> to vector<1x4x1xf32>
    %23 = vector.broadcast %22 : vector<1x4x1xf32> to vector<2x4x256xf32>
    %24 = arith.addf %20, %23 : vector<2x4x256xf32>
    %c0_10 = arith.constant 0 : index
    %c0_11 = arith.constant 0 : index
    %c0_12 = arith.constant 0 : index
    %25 = vector.load %arg5[%c0_10, %c0_11, %c0_12] : memref<2x4x256xf32, #tpu.memory_space<vmem>>, vector<2x4x256xf32>
    tpu.vector_store %arg5[%c0_10, %c0_11, %c0_12], %24 {strides = array<i32>} : memref<2x4x256xf32, #tpu.memory_space<vmem>>, vector<2x4x256xf32>,
    return
  }
  func.func @transform_0(%arg0: i32, %arg1: i32) -> (i32, i32, i32) {
    %c0_i32 = arith.constant 0 : i32
    %c0_i32_0 = arith.constant 0 : i32
    return %arg0, %c0_i32, %arg1 : i32, i32, i32
  }
  func.func @transform_1(%arg0: i32, %arg1: i32) -> (i32, i32) {
    %c0_i32 = arith.constant 0 : i32
    %c0_i32_0 = arith.constant 0 : i32
    %c0_i32_1 = arith.constant 0 : i32
    return %c0_i32, %c0_i32_0 : i32, i32
  }
  func.func @transform_2(%arg0: i32, %arg1: i32) -> (i32, i32) {
    %c0_i32 = arith.constant 0 : i32
    %c0_i32_0 = arith.constant 0 : i32
    %c0_i32_1 = arith.constant 0 : i32
    return %c0_i32, %c0_i32_0 : i32, i32
  }
  func.func @transform_3(%arg0: i32, %arg1: i32) -> (i32, i32, i32) {
    %c0_i32 = arith.constant 0 : i32
    %c0_i32_0 = arith.constant 0 : i32
    return %arg0, %c0_i32, %arg1 : i32, i32, i32
  }
}

</mosaic_0001>

<bundles_post_ra>
// kernel: tpu_custom_call.1
= control target key start
LH: loop header
LB: loop body
LE: loop exit
PB: predicated region body
PF: predicated region fallthrough
CT: control target
= control target key end

     0   :  { %8 = vsyncpa [#allocation3], 0  ;;  %s323_s0 = inlined_call_operand.hbm [shape: f32[2,4,256], index: 0, kind: input, shape index: {}]   ;;  %s324_s1 = inlined_call_operand.vmem [shape: f32[4,1], index: 1, kind: input, shape index: {}]   ;;  %s325_s2 = inlined_call_operand.vmem [shape: f32[4,1], index: 2, kind: input, shape index: {}]   ;;  %s326_s3 = inlined_call_operand.hbm [shape: f32[2,4,256], index: 3, kind: output, shape index: {}]  }
   0x1   :  { %9 = vsyncpa [#allocation4], 0  ;;  %s253_s12 = smov [#allocation2]   ;;  %s205_s16 = scalar_lea.hbm %s323_s0, 256 }
   0x2   :  { %s15_s13 = sshll.u32 %s253_s12, 4  ;;  %p206_p0 = scmp.ne.s32.totalorder %s323_s0, %s205_s16  ;;  %s16_s13 = int_to_ptr.vmem [resolvable:$true] %s15_s13 }
   0x3   :  { %p209_p1 = scmp.lt.u32.totalorder %s205_s16, %s323_s0 }
   0x5   :  { %p211_p2 = pnand %p209_p1, %p206_p0 }
   0x7   :  { %214 = shalt.err (!%p211_p2)
}
   0x8   :  { %s215_s21 = scalar_lea.vmem %s16_s13, 256  ;;  %p220_p4 = scmp.lt.s32.totalorder %s16_s13, %s16_s13 }
   0x9   :  { %p216_p3 = scmp.ne.s32.totalorder %s16_s13, %s215_s21  ;;  %p221_p5 = scmp.lt.s32.totalorder %s215_s21, %s215_s21 }
   0xb   :  { %p222_p6 = por %p221_p5, %p220_p4 }
   0xd   :  { %p223_p7 = pnand %p222_p6, %p216_p3 }
   0xf   :  { %226 = shalt.err (!%p223_p7)
}
  0x10   :  { %s254_s22 = smov 128   ;;  %s255_s23 = smov 8  }
  0x11   :  { %21 = dma.hbm_to_vmem [thread:$0]  %s323_s0, 256, %s16_s13, [#allocation3], %s254_s22, %s254_s22, %s255_s23  }
  0x12   :  { %249 = dma.done.wait [#allocation3], 256  }
  0x13   :  { %250 = vsyncadd [#allocation3], 4294967040  ;;  %v256_v0 = vmov 0   ;;  %v139_v1 = vld [vmem:[%s324_s1] sm:$0xf]  ;;  %v30_v4 = vld [vmem:[#allocation2 + $0x8] sm:$0xff] }
  0x14   :  { %194 = vset.pattern.permute.xlu0 %v256_v0  ;;  %v154_v2 = vld [vmem:[%s325_s2] sm:$0xf]  ;;  %vm37_vm0 = vcmask 1043456   ;;  %v34_v6 = vcombine.high %v30_v4, %v30_v4  ;;  %s258_s0 = smov [#allocation5]  }
  0x15   :  { %142 = vperm.xlu0 %194, %v139_v1   ;;  %v29_v3 = vld [vmem:[#allocation2] sm:$0xff]  ;;  %v52_v9 = vsel %vm37_vm0, %v30_v4, 0.0  ;;  %s176_s1 = sshll.u32 %s258_s0, 4  ;;  %s177_s1 = int_to_ptr.vmem [resolvable:$true] %s176_s1 }
  0x16   :  { %v33_v5 = vcombine.high %v29_v3, %v29_v3  ;;  %v38_v7 = vsel %vm37_vm0, %v29_v3, 0.0  ;;  %v59_v10 = vsel %vm37_vm0, %v34_v6, 0.0  ;;  %v53_v13 = vrot.slane %v52_v9, 4  ;;  %s227_s2 = scalar_lea.vmem %s177_s1, 256  ;;  %p232_p9 = scmp.lt.s32.totalorder %s177_s1, %s177_s1 }
  0x17   :  { %v39_v11 = vrot.slane %v38_v7, 4  ;;  %v60_v14 = vrot.slane %v59_v10, 4  ;;  %p228_p8 = scmp.ne.s32.totalorder %s177_s1, %s227_s2  ;;  %p233_p10 = scmp.lt.s32.totalorder %s227_s2, %s227_s2 }
  0x18   :  { %v45_v8 = vsel %vm37_vm0, %v33_v5, 0.0  ;;  %v54_v17 = vadd.f32 %v53_v13, %v52_v9 }
  0x19   :  { %157 = vperm.xlu0 %194, %v154_v2   ;;  %v46_v12 = vrot.slane %v45_v8, 4  ;;  %v40_v15 = vadd.f32 %v39_v11, %v38_v7  ;;  %v61_v18 = vadd.f32 %v60_v14, %v59_v10  ;;  %p234_p11 = por %p233_p10, %p232_p9 }
  0x1a   :  { %v55_v21 = vrot.slane %v54_v17, 2 }
  0x1b   :  { %v47_v16 = vadd.f32 %v46_v12, %v45_v8  ;;  %v41_v19 = vrot.slane %v40_v15, 2  ;;  %v62_v22 = vrot.slane %v61_v18, 2  ;;  %p235_p12 = pnand %p234_p11, %p228_p8 }
  0x1c   :  { %v56_v25 = vadd.f32 %v55_v21, %v54_v17  ;;  %v147_v21 = vlaneseq }
  0x1d   :  { %v48_v20 = vrot.slane %v47_v16, 2  ;;  %v42_v23 = vadd.f32 %v41_v19, %v40_v15  ;;  %v63_v26 = vadd.f32 %v62_v22, %v61_v18  ;;  %v257_v19 = vmov 839922192  }
  0x1e   :  { %v57_v29 = vrot.slane %v56_v25, 1 }
  0x1f   :  { %v49_v24 = vadd.f32 %v48_v20, %v47_v16  ;;  %v43_v27 = vrot.slane %v42_v23, 1  ;;  %v64_v30 = vrot.slane %v63_v26, 1  ;;  %v145_v20 = vunpack.c.l.s4 %v257_v19 }
  0x20   :  { %v58_v33 = vadd.f32 %v57_v29, %v56_v25 }
  0x21   :  { %v50_v28 = vrot.slane %v49_v24, 1  ;;  %v44_v31 = vadd.f32 %v43_v27, %v42_v23  ;;  %v65_v34 = vadd.f32 %v64_v30, %v63_v26  ;;  %v146_v25 = vunpack.c.0.s8 %v145_v20 }
  0x22   :  { %v69_v37 = vmul.f32 0.25, %v58_v33  ;;  %v148_v26 = vshrl.u32 %v147_v21, 7 }
  0x23   :  { %v51_v32 = vadd.f32 %v50_v28, %v49_v24  ;;  %v67_v35 = vmul.f32 0.25, %v44_v31  ;;  %v70_v38 = vmul.f32 0.25, %v65_v34 }
  0x24   :  { %v149_v28 = vsub.s32 %v146_v25, %v148_v26 }
  0x25   :  { %v68_v36 = vmul.f32 0.25, %v51_v32  ;;  %v76_v40 = vcombine.low %v69_v37, %v70_v38 }
  0x27   :  { %v75_v39 = vcombine.low %v67_v35, %v68_v36  ;;  %v80_v42 = vsub.f32 %v30_v4, %v76_v40 }
  0x29   :  { %v79_v41 = vsub.f32 %v29_v3, %v75_v39  ;;  %v82_v44 = vmul.f32 %v80_v42, %v80_v42 }
  0x2b   :  { %v81_v43 = vmul.f32 %v79_v41, %v79_v41  ;;  %v86_v46 = vcombine.high %v82_v44, %v82_v44  ;;  %v103_v48 = vsel %vm37_vm0, %v82_v44, 0.0 }
  0x2c   :  { %v104_v52 = vrot.slane %v103_v48, 4 }
  0x2d   :  { %v85_v45 = vcombine.high %v81_v43, %v81_v43  ;;  %v89_v47 = vsel %vm37_vm0, %v81_v43, 0.0  ;;  %v110_v51 = vsel %vm37_vm0, %v86_v46, 0.0 }
  0x2e   :  { %v90_v50 = vrot.slane %v89_v47, 4  ;;  %v111_v54 = vrot.slane %v110_v51, 4  ;;  %v105_v56 = vadd.f32 %v104_v52, %v103_v48 }
  0x2f   :  { %v96_v49 = vsel %vm37_vm0, %v85_v45, 0.0 }
  0x30   :  { %v97_v53 = vrot.slane %v96_v49, 4  ;;  %v91_v55 = vadd.f32 %v90_v50, %v89_v47  ;;  %v112_v58 = vadd.f32 %v111_v54, %v110_v51  ;;  %v106_v60 = vrot.slane %v105_v56, 2 }
  0x32   :  { %v98_v57 = vadd.f32 %v97_v53, %v96_v49  ;;  %v92_v59 = vrot.slane %v91_v55, 2  ;;  %v113_v62 = vrot.slane %v112_v58, 2  ;;  %v107_v0 = vadd.f32 %v106_v60, %v105_v56 }
  0x34   :  { %v99_v61 = vrot.slane %v98_v57, 2  ;;  %v93_v63 = vadd.f32 %v92_v59, %v91_v55  ;;  %v114_v2 = vadd.f32 %v113_v62, %v112_v58  ;;  %v108_v4 = vrot.slane %v107_v0, 1 }
  0x36   :  { %v100_v1 = vadd.f32 %v99_v61, %v98_v57  ;;  %v94_v3 = vrot.slane %v93_v63, 1  ;;  %v115_v6 = vrot.slane %v114_v2, 1  ;;  %v109_v8 = vadd.f32 %v108_v4, %v107_v0 }
  0x38   :  { %v101_v5 = vrot.slane %v100_v1, 1  ;;  %v95_v7 = vadd.f32 %v94_v3, %v93_v63  ;;  %v116_v10 = vadd.f32 %v115_v6, %v114_v2  ;;  %v119_v12 = vmul.f32 0.25, %v109_v8 }
  0x3a   :  { %v102_v9 = vadd.f32 %v101_v5, %v100_v1  ;;  %v117_v11 = vmul.f32 0.25, %v95_v7  ;;  %v120_v14 = vmul.f32 0.25, %v116_v10  ;;  %v123_v16 = vadd.f32 1e-06, %v119_v12 }
  0x3c   :  { %v118_v13 = vmul.f32 0.25, %v102_v9  ;;  %v121_v15 = vadd.f32 1e-06, %v117_v11  ;;  %v124_v18 = vadd.f32 1e-06, %v120_v14 }
  0x3e   :  { %v122_v17 = vadd.f32 1e-06, %v118_v13  ;;  %197 = vrsqrt.f32 %v121_v15 }
  0x3f   :  { %199 = vrsqrt.f32 %v123_v16 }
  0x40   :  { %201 = vrsqrt.f32 %v122_v17 }
  0x41   :  { %203 = vrsqrt.f32 %v124_v18 }
  0x48   :  { %v198_v22 = vpop.eup %197 }
  0x49   :  { %v200_v23 = vpop.eup %199 }
  0x4a   :  { %v202_v24 = vpop.eup %201 }
  0x4b   :  { %v204_v27 = vpop.eup %203  ;;  %v133_v29 = vcombine.low %v198_v22, %v202_v24 }
  0x4c   :  { %v134_v30 = vcombine.low %v200_v23, %v204_v27 }
  0x4d   :  { %v137_v32 = vmul.f32 %v133_v29, %v79_v41 }
  0x4e   :  { %v138_v33 = vmul.f32 %v134_v30, %v80_v42 }
  0x94   :  { %v143_v31 = vpop.permute.xlu0 %142 }
  0x95   :  { %v150_v34 = vrot.slane %v143_v31, %v149_v28 }
  0x97   :  { %v152_v36 = vmul.f32 %v150_v34, %v137_v32  ;;  %v153_v37 = vmul.f32 %v150_v34, %v138_v33 }
  0x98   :  { %v158_v35 = vpop.permute.xlu0 %157 }
  0x99   :  { %v165_v38 = vrot.slane %v158_v35, %v149_v28 }
  0x9b   :  { %v167_v39 = vadd.f32 %v165_v38, %v152_v36  ;;  %v168_v40 = vadd.f32 %v165_v38, %v153_v37 }
  0x9d   :  { %169 = vst [vmem:[#allocation5] sm:$0xff] %v167_v39  ;;  %170 = vst [vmem:[#allocation5 + $0x8] sm:$0xff] %v168_v40 }
  0x9e   :  { %238 = shalt.err (!%p235_p12)
}
  0x9f   :  { %s239_s5 = scalar_lea.hbm %s326_s3, 256 }
  0xa0   :  { %p240_p13 = scmp.ne.s32.totalorder %s326_s3, %s239_s5  ;;  %p243_p0 = scmp.lt.u32.totalorder %s239_s5, %s326_s3 }
  0xa2   :  { %p245_p1 = pnand %p243_p0, %p240_p13 }
  0xa4   :  { %248 = shalt.err (!%p245_p1)
}
  0xa5   :  { %182 = dma.vmem_to_hbm [thread:$0]  %s177_s1, 256, %s326_s3, [#allocation4], %s254_s22, %s254_s22, %s255_s23  }
  0xa6   :  { %251 = dma.done.wait [#allocation4], 256  }
  0xa7   :  { %252 = vsyncadd [#allocation4], 4294967040 }
  0xa8   :  { %186 = vsyncpa [#allocation3], 1 }
  0xa9   :  { %187 = vsyncpa [#allocation4], 1 }

</bundles_post_ra>
